<compile_context>
chip_gen: v7x
topology: tpu7x:2x2x1
jax: 0.10.0
libtpu: 0.0.40
codegen_flags: <defaults>
</compile_context>

<pallas_src>
import functools
import math

import jax
import jax.numpy as jnp
from jax.experimental import pallas as pl
from jax.experimental.pallas import tpu as pltpu  # noqa: F401  (kept for CompilerParams if tiled later)


BN_EPS = 1e-5
# VMEM residency guard for the single-block fused kernels (default scoped VMEM
# is 16-32 MiB depending on generation; leave headroom for double buffering).
_VMEM_BUDGET_BYTES = 16 * 1024 * 1024


# ----------------------------------------------------------------------------
# Pallas kernels: fused (conv-as-matmul) + train-mode BN [+ residual] + ReLU
# Activations inside the kernels are (C, M) with the long M axis on lanes.
# ----------------------------------------------------------------------------
def _bn_train(y, gamma, beta, eps):
    """Train-mode BatchNorm over the M axis of (C, M): batch stats, biased var."""
    mean = jnp.mean(y, axis=-1, keepdims=True)                    # lane reduction (XLU)
    var = jnp.mean(jnp.square(y - mean), axis=-1, keepdims=True)  # biased variance
    return (y - mean) * jax.lax.rsqrt(var + eps) * gamma + beta   # rsqrt -> EUP


def _conv_bn_relu_kernel(colsT_ref, wT_ref, g_ref, b_ref, o_ref, *, eps):
    # (Cout, K) @ (K, M) on the MXU, then BN + ReLU.  Conv bias omitted
    # (exactly cancelled by the BN mean subtraction).
    y = jnp.dot(wT_ref[...], colsT_ref[...], preferred_element_type=jnp.float32)
    o_ref[...] = jnp.maximum(_bn_train(y, g_ref[...], b_ref[...], eps), 0.0)


def _conv_bn_add_relu_kernel(colsT_ref, wT_ref, g_ref, b_ref, resT_ref, o_ref,
                             *, eps):
    # Second conv of a block with identity residual.
    y = jnp.dot(wT_ref[...], colsT_ref[...], preferred_element_type=jnp.float32)
    o_ref[...] = jnp.maximum(
        _bn_train(y, g_ref[...], b_ref[...], eps) + resT_ref[...], 0.0)


def _conv_bn_proj_relu_kernel(colsT_ref, wT_ref, g_ref, b_ref,
                              xsT_ref, wrT_ref, br_ref, o_ref, *, eps):
    # Second conv of a block with projection (1x1 conv, stride s) residual,
    # also fused into this single kernel.  The 1x1-conv bias is kept (no BN
    # follows it).
    y = jnp.dot(wT_ref[...], colsT_ref[...], preferred_element_type=jnp.float32)
    res = jnp.dot(wrT_ref[...], xsT_ref[...],
                  preferred_element_type=jnp.float32) + br_ref[...]
    o_ref[...] = jnp.maximum(_bn_train(y, g_ref[...], b_ref[...], eps) + res, 0.0)


def _call_fused(kernel, out_shape, operands):
    nbytes = 4 * math.prod(out_shape) + sum(
        math.prod(o.shape) * o.dtype.itemsize for o in operands)
    # BN stats are computed over the whole M axis, so the activation must be
    # resident in one block.  Guard so a larger configuration fails loudly
    # instead of silently computing per-tile statistics.
    # TODO(synk): replace single-block residency with an M-tiled grid plus a
    # two-pass BN (accumulate stats, then normalize) for real ResNet18 shapes.
    assert nbytes < _VMEM_BUDGET_BYTES, (
        f"fused conv kernel operands ({nbytes} B) exceed single-block VMEM "
        "budget; tile M with a two-pass BN")
    return pl.pallas_call(
        kernel,
        out_shape=jax.ShapeDtypeStruct(out_shape, jnp.float32),
    )(*operands)


# ----------------------------------------------------------------------------
# Glue: channel-major im2col (pure data movement in the wrapper, no FLOPs)
# ----------------------------------------------------------------------------
def _im2colT(x_c, kh, kw, stride, pad):
    """x_c: (C, N, H, W) -> colsT (kh*kw*C, N*Ho*Wo), K ordered (kh, kw, c)."""
    C, N, H, W = x_c.shape
    Ho = (H + 2 * pad - kh) // stride + 1
    Wo = (W + 2 * pad - kw) // stride + 1
    xp = jnp.pad(x_c, ((0, 0), (0, 0), (pad, pad), (pad, pad)))
    taps = []
    for i in range(kh):
        for j in range(kw):
            taps.append(xp[:, :, i:i + stride * Ho:stride, j:j + stride * Wo:stride])
    colsT = jnp.stack(taps, axis=0).reshape(kh * kw * C, N * Ho * Wo)
    return colsT, (N, Ho, Wo)


# ----------------------------------------------------------------------------
# ResNet18ConvBlock / ResNet18Module forward (channel-major internally)
# ----------------------------------------------------------------------------
def resnet_conv_block(x_c, p, stride, eps=BN_EPS):
    """x_c: (Cin, N, H, W) channel-major. Returns (Cout, N, Ho, Wo)."""
    Cin, N, H, W = x_c.shape
    Cout = p["w1"].shape[-1]

    # ---- conv1 (3x3, stride s) + BN1 + ReLU, one fused kernel -------------
    cols1, (n, ho, wo) = _im2colT(x_c, 3, 3, stride, 1)
    M = n * ho * wo
    w1T = p["w1"].reshape(9 * Cin, Cout).T          # (Cout, 9*Cin)
    y1 = _call_fused(
        functools.partial(_conv_bn_relu_kernel, eps=eps),
        (Cout, M),
        (cols1, w1T, p["g1"].reshape(Cout, 1), p["be1"].reshape(Cout, 1)))
    y1_c = y1.reshape(Cout, n, ho, wo)

    # ---- conv2 (3x3, stride 1) + BN2 + residual + ReLU, one fused kernel --
    cols2, _ = _im2colT(y1_c, 3, 3, 1, 1)
    w2T = p["w2"].reshape(9 * Cout, Cout).T         # (Cout, 9*Cout)
    g2 = p["g2"].reshape(Cout, 1)
    be2 = p["be2"].reshape(Cout, 1)

    if "wr" in p:
        # projection residual: 1x1 conv with stride s (matmul fused in-kernel)
        xsT = x_c[:, :, ::stride, ::stride].reshape(Cin, M)
        wrT = p["wr"].reshape(Cin, Cout).T          # (Cout, Cin)
        out = _call_fused(
            functools.partial(_conv_bn_proj_relu_kernel, eps=eps),
            (Cout, M),
            (cols2, w2T, g2, be2, xsT, wrT, p["br"].reshape(Cout, 1)))
    else:
        # identity residual (only valid for stride==1, Cin==Cout)
        assert stride == 1 and Cin == Cout, "identity residual needs stride=1, Cin==Cout"
        out = _call_fused(
            functools.partial(_conv_bn_add_relu_kernel, eps=eps),
            (Cout, M),
            (cols2, w2T, g2, be2, x_c.reshape(Cout, M)))

    return out.reshape(Cout, n, ho, wo)


def resnet18_module(x_nchw, params, halve_spatially=True):
    x_c = jnp.transpose(x_nchw, (1, 0, 2, 3))   # NCHW -> channel-major CNHW
    stride = 2 if halve_spatially else 1
    y = resnet_conv_block(x_c, params["block1"], stride)
    y = resnet_conv_block(y, params["block2"], 1)
    return jnp.transpose(y, (1, 0, 2, 3))       # CNHW -> NCHW


# ----------------------------------------------------------------------------
# Deterministic parameter init (shapes follow the PyTorch module's __init__).
# b1/b2 are created (and used by the f32 reference) but deliberately unused by
# the kernels: they are exactly cancelled by training-mode BatchNorm.
# ----------------------------------------------------------------------------
def init_block_params(key, cin, cout, proj):
    ks = jax.random.split(key, 6)
    p = {
        "w1": 0.1 * jax.random.normal(ks[0], (3, 3, cin, cout), jnp.float32),
        "b1": 0.05 * jax.random.normal(ks[1], (cout,), jnp.float32),
        "g1": jnp.ones((cout,), jnp.float32),
        "be1": jnp.zeros((cout,), jnp.float32),
        "w2": 0.1 * jax.random.normal(ks[2], (3, 3, cout, cout), jnp.float32),
        "b2": 0.05 * jax.random.normal(ks[3], (cout,), jnp.float32),
        "g2": jnp.ones((cout,), jnp.float32),
        "be2": jnp.zeros((cout,), jnp.float32),
    }
    if proj:  # out_channels != in_channels -> 1x1 conv residual
        p["wr"] = 0.1 * jax.random.normal(ks[4], (1, 1, cin, cout), jnp.float32)
        p["br"] = 0.05 * jax.random.normal(ks[5], (cout,), jnp.float32)
    return p


def init_params(key, cin, cout):
    k1, k2 = jax.random.split(key)
    return {
        "block1": init_block_params(k1, cin, cout, proj=(cin != cout)),
        "block2": init_block_params(k2, cout, cout, proj=False),
    }


# ----------------------------------------------------------------------------
# Pure-JAX reference (for correctness check; includes the conv biases)
# ----------------------------------------------------------------------------
def _ref_conv(x, w, b, stride, pad):
    return jax.lax.conv_general_dilated(
        x, w, window_strides=(stride, stride), padding=[(pad, pad), (pad, pad)],
        dimension_numbers=("NHWC", "HWIO", "NHWC")) + b


def _ref_bn(y, g, b, eps=BN_EPS):
    mean = jnp.mean(y, axis=(0, 1, 2), keepdims=True)
    var = jnp.mean(jnp.square(y - mean), axis=(0, 1, 2), keepdims=True)
    return (y - mean) * jax.lax.rsqrt(var + eps) * g + b


def _ref_block(x, p, stride):
    y = jax.nn.relu(_ref_bn(_ref_conv(x, p["w1"], p["b1"], stride, 1), p["g1"], p["be1"]))
    y = _ref_bn(_ref_conv(y, p["w2"], p["b2"], 1, 1), p["g2"], p["be2"])
    r = _ref_conv(x, p["wr"], p["br"], stride, 0) if "wr" in p else x
    return jax.nn.relu(y + r)


def _ref_module(x_nchw, params, halve_spatially=True):
    x = jnp.transpose(x_nchw, (0, 2, 3, 1))
    y = _ref_block(x, params["block1"], 2 if halve_spatially else 1)
    y = _ref_block(y, params["block2"], 1)
    return jnp.transpose(y, (0, 3, 1, 2))


# ----------------------------------------------------------------------------
if __name__ == "__main__":
    key = jax.random.PRNGKey(0)
    kx, kp = jax.random.split(key)

    N, Cin, H, W = 2, 4, 16, 16   # small NCHW input, like the PyTorch module expects
    Cout = 8
    x = jax.random.normal(kx, (N, Cin, H, W), jnp.float32)
    params = init_params(kp, Cin, Cout)

    fwd = jax.jit(resnet18_module, static_argnames=("halve_spatially",))
    out = jax.block_until_ready(fwd(x, params, halve_spatially=True))
    assert out.shape == (N, Cout, H // 2, W // 2), out.shape

    ref = jax.block_until_ready(_ref_module(x, params, halve_spatially=True))
    max_err = float(jnp.max(jnp.abs(out - ref)))
    assert jnp.allclose(out, ref, atol=1e-3, rtol=1e-3), max_err

    # TODO(synk): PyTorch BatchNorm also updates running_mean/running_var buffers
    # in training mode; that side effect does not affect the forward output.
    print("KERNEL_OK")
</pallas_src>

<mosaic_0001>
module attributes {stable_mosaic.version = 11 : i64} {
  func.func @_conv_bn_relu_kernel(%arg0: memref<36x128xf32, #tpu.memory_space<vmem>>, %arg1: memref<8x36xf32, #tpu.memory_space<vmem>>, %arg2: memref<8x1xf32, #tpu.memory_space<vmem>>, %arg3: memref<8x1xf32, #tpu.memory_space<vmem>>, %arg4: memref<8x128xf32, #tpu.memory_space<vmem>>) attributes {dimension_semantics = [], scalar_prefetch = 0 : i64, scratch_operands = 0 : i64, tpu.core_type = #tpu.core_type<tc>} {
    %c0 = arith.constant 0 : index
    %c0_0 = arith.constant 0 : index
    %0 = vector.load %arg1[%c0, %c0_0] : memref<8x36xf32, #tpu.memory_space<vmem>>, vector<8x36xf32>
    %c0_1 = arith.constant 0 : index
    %c0_2 = arith.constant 0 : index
    %1 = vector.load %arg0[%c0_1, %c0_2] : memref<36x128xf32, #tpu.memory_space<vmem>>, vector<36x128xf32>
    %cst = arith.constant dense<0.000000e+00> : vector<8x128xf32>
    %2 = tpu.matmul %0, %1, %cst {dimension_numbers = #tpu.dot_dimension_numbers<[1], [0], [0], [1], [0, 0, 1, 1], [], []>} : vector<8x36xf32>, vector<36x128xf32>, vector<8x128xf32> -> vector<8x128xf32>
    %c0_3 = arith.constant 0 : index
    %c0_4 = arith.constant 0 : index
    %3 = vector.load %arg2[%c0_3, %c0_4] : memref<8x1xf32, #tpu.memory_space<vmem>>, vector<8x1xf32>
    %c0_5 = arith.constant 0 : index
    %c0_6 = arith.constant 0 : index
    %4 = vector.load %arg3[%c0_5, %c0_6] : memref<8x1xf32, #tpu.memory_space<vmem>>, vector<8x1xf32>
    %cst_7 = arith.constant dense<0.000000e+00> : vector<8xf32>
    %5 = vector.multi_reduction <add>, %2, %cst_7 [1] : vector<8x128xf32> to vector<8xf32>
    %6 = vector.shape_cast %5 : vector<8xf32> to vector<8x1xf32>
    %cst_8 = arith.constant 1.280000e+02 : f32
    %7 = vector.broadcast %cst_8 : f32 to vector<8x1xf32>
    %8 = arith.divf %6, %7 : vector<8x1xf32>
    %9 = vector.broadcast %8 : vector<8x1xf32> to vector<8x128xf32>
    %10 = arith.subf %2, %9 : vector<8x128xf32>
    %11 = arith.mulf %10, %10 : vector<8x128xf32>
    %cst_9 = arith.constant dense<0.000000e+00> : vector<8xf32>
    %12 = vector.multi_reduction <add>, %11, %cst_9 [1] : vector<8x128xf32> to vector<8xf32>
    %13 = vector.shape_cast %12 : vector<8xf32> to vector<8x1xf32>
    %cst_10 = arith.constant 1.280000e+02 : f32
    %14 = vector.broadcast %cst_10 : f32 to vector<8x1xf32>
    %15 = arith.divf %13, %14 : vector<8x1xf32>
    %16 = vector.broadcast %8 : vector<8x1xf32> to vector<8x128xf32>
    %17 = arith.subf %2, %16 : vector<8x128xf32>
    %cst_11 = arith.constant 9.99999974E-6 : f32
    %18 = vector.broadcast %cst_11 : f32 to vector<8x1xf32>
    %19 = arith.addf %15, %18 : vector<8x1xf32>
    %20 = math.rsqrt %19 : vector<8x1xf32>
    %21 = vector.broadcast %20 : vector<8x1xf32> to vector<8x128xf32>
    %22 = arith.mulf %17, %21 : vector<8x128xf32>
    %23 = vector.broadcast %3 : vector<8x1xf32> to vector<8x128xf32>
    %24 = arith.mulf %22, %23 : vector<8x128xf32>
    %25 = vector.broadcast %4 : vector<8x1xf32> to vector<8x128xf32>
    %26 = arith.addf %24, %25 : vector<8x128xf32>
    %cst_12 = arith.constant 0.000000e+00 : f32
    %27 = vector.broadcast %cst_12 : f32 to vector<8x128xf32>
    %28 = arith.maximumf %26, %27 : vector<8x128xf32>
    %c0_13 = arith.constant 0 : index
    %c0_14 = arith.constant 0 : index
    %29 = vector.load %arg4[%c0_13, %c0_14] : memref<8x128xf32, #tpu.memory_space<vmem>>, vector<8x128xf32>
    tpu.vector_store %arg4[%c0_13, %c0_14], %28 {strides = array<i32>} : memref<8x128xf32, #tpu.memory_space<vmem>>, vector<8x128xf32>,
    return
  }
}

module attributes {stable_mosaic.version = 11 : i64} {
  func.func @_conv_bn_add_relu_kernel(%arg0: memref<72x128xf32, #tpu.memory_space<vmem>>, %arg1: memref<8x72xf32, #tpu.memory_space<vmem>>, %arg2: memref<8x1xf32, #tpu.memory_space<vmem>>, %arg3: memref<8x1xf32, #tpu.memory_space<vmem>>, %arg4: memref<8x128xf32, #tpu.memory_space<vmem>>, %arg5: memref<8x128xf32, #tpu.memory_space<vmem>>) attributes {dimension_semantics = [], scalar_prefetch = 0 : i64, scratch_operands = 0 : i64, tpu.core_type = #tpu.core_type<tc>} {
    %c0 = arith.constant 0 : index
    %c0_0 = arith.constant 0 : index
    %0 = vector.load %arg1[%c0, %c0_0] : memref<8x72xf32, #tpu.memory_space<vmem>>, vector<8x72xf32>
    %c0_1 = arith.constant 0 : index
    %c0_2 = arith.constant 0 : index
    %1 = vector.load %arg0[%c0_1, %c0_2] : memref<72x128xf32, #tpu.memory_space<vmem>>, vector<72x128xf32>
    %cst = arith.constant dense<0.000000e+00> : vector<8x128xf32>
    %2 = tpu.matmul %0, %1, %cst {dimension_numbers = #tpu.dot_dimension_numbers<[1], [0], [0], [1], [0, 0, 1, 1], [], []>} : vector<8x72xf32>, vector<72x128xf32>, vector<8x128xf32> -> vector<8x128xf32>
    %c0_3 = arith.constant 0 : index
    %c0_4 = arith.constant 0 : index
    %3 = vector.load %arg2[%c0_3, %c0_4] : memref<8x1xf32, #tpu.memory_space<vmem>>, vector<8x1xf32>
    %c0_5 = arith.constant 0 : index
    %c0_6 = arith.constant 0 : index
    %4 = vector.load %arg3[%c0_5, %c0_6] : memref<8x1xf32, #tpu.memory_space<vmem>>, vector<8x1xf32>
    %cst_7 = arith.constant dense<0.000000e+00> : vector<8xf32>
    %5 = vector.multi_reduction <add>, %2, %cst_7 [1] : vector<8x128xf32> to vector<8xf32>
    %6 = vector.shape_cast %5 : vector<8xf32> to vector<8x1xf32>
    %cst_8 = arith.constant 1.280000e+02 : f32
    %7 = vector.broadcast %cst_8 : f32 to vector<8x1xf32>
    %8 = arith.divf %6, %7 : vector<8x1xf32>
    %9 = vector.broadcast %8 : vector<8x1xf32> to vector<8x128xf32>
    %10 = arith.subf %2, %9 : vector<8x128xf32>
    %11 = arith.mulf %10, %10 : vector<8x128xf32>
    %cst_9 = arith.constant dense<0.000000e+00> : vector<8xf32>
    %12 = vector.multi_reduction <add>, %11, %cst_9 [1] : vector<8x128xf32> to vector<8xf32>
    %13 = vector.shape_cast %12 : vector<8xf32> to vector<8x1xf32>
    %cst_10 = arith.constant 1.280000e+02 : f32
    %14 = vector.broadcast %cst_10 : f32 to vector<8x1xf32>
    %15 = arith.divf %13, %14 : vector<8x1xf32>
    %16 = vector.broadcast %8 : vector<8x1xf32> to vector<8x128xf32>
    %17 = arith.subf %2, %16 : vector<8x128xf32>
    %cst_11 = arith.constant 9.99999974E-6 : f32
    %18 = vector.broadcast %cst_11 : f32 to vector<8x1xf32>
    %19 = arith.addf %15, %18 : vector<8x1xf32>
    %20 = math.rsqrt %19 : vector<8x1xf32>
    %21 = vector.broadcast %20 : vector<8x1xf32> to vector<8x128xf32>
    %22 = arith.mulf %17, %21 : vector<8x128xf32>
    %23 = vector.broadcast %3 : vector<8x1xf32> to vector<8x128xf32>
    %24 = arith.mulf %22, %23 : vector<8x128xf32>
    %25 = vector.broadcast %4 : vector<8x1xf32> to vector<8x128xf32>
    %26 = arith.addf %24, %25 : vector<8x128xf32>
    %c0_12 = arith.constant 0 : index
    %c0_13 = arith.constant 0 : index
    %27 = vector.load %arg4[%c0_12, %c0_13] : memref<8x128xf32, #tpu.memory_space<vmem>>, vector<8x128xf32>
    %28 = arith.addf %26, %27 : vector<8x128xf32>
    %cst_14 = arith.constant 0.000000e+00 : f32
    %29 = vector.broadcast %cst_14 : f32 to vector<8x128xf32>
    %30 = arith.maximumf %28, %29 : vector<8x128xf32>
    %c0_15 = arith.constant 0 : index
    %c0_16 = arith.constant 0 : index
    %31 = vector.load %arg5[%c0_15, %c0_16] : memref<8x128xf32, #tpu.memory_space<vmem>>, vector<8x128xf32>
    tpu.vector_store %arg5[%c0_15, %c0_16], %30 {strides = array<i32>} : memref<8x128xf32, #tpu.memory_space<vmem>>, vector<8x128xf32>,
    return
  }
}

module attributes {stable_mosaic.version = 11 : i64} {
  func.func @_conv_bn_relu_kernel(%arg0: memref<72x128xf32, #tpu.memory_space<vmem>>, %arg1: memref<8x72xf32, #tpu.memory_space<vmem>>, %arg2: memref<8x1xf32, #tpu.memory_space<vmem>>, %arg3: memref<8x1xf32, #tpu.memory_space<vmem>>, %arg4: memref<8x128xf32, #tpu.memory_space<vmem>>) attributes {dimension_semantics = [], scalar_prefetch = 0 : i64, scratch_operands = 0 : i64, tpu.core_type = #tpu.core_type<tc>} {
    %c0 = arith.constant 0 : index
    %c0_0 = arith.constant 0 : index
    %0 = vector.load %arg1[%c0, %c0_0] : memref<8x72xf32, #tpu.memory_space<vmem>>, vector<8x72xf32>
    %c0_1 = arith.constant 0 : index
    %c0_2 = arith.constant 0 : index
    %1 = vector.load %arg0[%c0_1, %c0_2] : memref<72x128xf32, #tpu.memory_space<vmem>>, vector<72x128xf32>
    %cst = arith.constant dense<0.000000e+00> : vector<8x128xf32>
    %2 = tpu.matmul %0, %1, %cst {dimension_numbers = #tpu.dot_dimension_numbers<[1], [0], [0], [1], [0, 0, 1, 1], [], []>} : vector<8x72xf32>, vector<72x128xf32>, vector<8x128xf32> -> vector<8x128xf32>
    %c0_3 = arith.constant 0 : index
    %c0_4 = arith.constant 0 : index
    %3 = vector.load %arg2[%c0_3, %c0_4] : memref<8x1xf32, #tpu.memory_space<vmem>>, vector<8x1xf32>
    %c0_5 = arith.constant 0 : index
    %c0_6 = arith.constant 0 : index
    %4 = vector.load %arg3[%c0_5, %c0_6] : memref<8x1xf32, #tpu.memory_space<vmem>>, vector<8x1xf32>
    %cst_7 = arith.constant dense<0.000000e+00> : vector<8xf32>
    %5 = vector.multi_reduction <add>, %2, %cst_7 [1] : vector<8x128xf32> to vector<8xf32>
    %6 = vector.shape_cast %5 : vector<8xf32> to vector<8x1xf32>
    %cst_8 = arith.constant 1.280000e+02 : f32
    %7 = vector.broadcast %cst_8 : f32 to vector<8x1xf32>
    %8 = arith.divf %6, %7 : vector<8x1xf32>
    %9 = vector.broadcast %8 : vector<8x1xf32> to vector<8x128xf32>
    %10 = arith.subf %2, %9 : vector<8x128xf32>
    %11 = arith.mulf %10, %10 : vector<8x128xf32>
    %cst_9 = arith.constant dense<0.000000e+00> : vector<8xf32>
    %12 = vector.multi_reduction <add>, %11, %cst_9 [1] : vector<8x128xf32> to vector<8xf32>
    %13 = vector.shape_cast %12 : vector<8xf32> to vector<8x1xf32>
    %cst_10 = arith.constant 1.280000e+02 : f32
    %14 = vector.broadcast %cst_10 : f32 to vector<8x1xf32>
    %15 = arith.divf %13, %14 : vector<8x1xf32>
    %16 = vector.broadcast %8 : vector<8x1xf32> to vector<8x128xf32>
    %17 = arith.subf %2, %16 : vector<8x128xf32>
    %cst_11 = arith.constant 9.99999974E-6 : f32
    %18 = vector.broadcast %cst_11 : f32 to vector<8x1xf32>
    %19 = arith.addf %15, %18 : vector<8x1xf32>
    %20 = math.rsqrt %19 : vector<8x1xf32>
    %21 = vector.broadcast %20 : vector<8x1xf32> to vector<8x128xf32>
    %22 = arith.mulf %17, %21 : vector<8x128xf32>
    %23 = vector.broadcast %3 : vector<8x1xf32> to vector<8x128xf32>
    %24 = arith.mulf %22, %23 : vector<8x128xf32>
    %25 = vector.broadcast %4 : vector<8x1xf32> to vector<8x128xf32>
    %26 = arith.addf %24, %25 : vector<8x128xf32>
    %cst_12 = arith.constant 0.000000e+00 : f32
    %27 = vector.broadcast %cst_12 : f32 to vector<8x128xf32>
    %28 = arith.maximumf %26, %27 : vector<8x128xf32>
    %c0_13 = arith.constant 0 : index
    %c0_14 = arith.constant 0 : index
    %29 = vector.load %arg4[%c0_13, %c0_14] : memref<8x128xf32, #tpu.memory_space<vmem>>, vector<8x128xf32>
    tpu.vector_store %arg4[%c0_13, %c0_14], %28 {strides = array<i32>} : memref<8x128xf32, #tpu.memory_space<vmem>>, vector<8x128xf32>,
    return
  }
}

module attributes {stable_mosaic.version = 11 : i64} {
  func.func @_conv_bn_proj_relu_kernel(%arg0: memref<72x128xf32, #tpu.memory_space<vmem>>, %arg1: memref<8x72xf32, #tpu.memory_space<vmem>>, %arg2: memref<8x1xf32, #tpu.memory_space<vmem>>, %arg3: memref<8x1xf32, #tpu.memory_space<vmem>>, %arg4: memref<4x128xf32, #tpu.memory_space<vmem>>, %arg5: memref<8x4xf32, #tpu.memory_space<vmem>>, %arg6: memref<8x1xf32, #tpu.memory_space<vmem>>, %arg7: memref<8x128xf32, #tpu.memory_space<vmem>>) attributes {dimension_semantics = [], scalar_prefetch = 0 : i64, scratch_operands = 0 : i64, tpu.core_type = #tpu.core_type<tc>} {
    %c0 = arith.constant 0 : index
    %c0_0 = arith.constant 0 : index
    %0 = vector.load %arg1[%c0, %c0_0] : memref<8x72xf32, #tpu.memory_space<vmem>>, vector<8x72xf32>
    %c0_1 = arith.constant 0 : index
    %c0_2 = arith.constant 0 : index
    %1 = vector.load %arg0[%c0_1, %c0_2] : memref<72x128xf32, #tpu.memory_space<vmem>>, vector<72x128xf32>
    %cst = arith.constant dense<0.000000e+00> : vector<8x128xf32>
    %2 = tpu.matmul %0, %1, %cst {dimension_numbers = #tpu.dot_dimension_numbers<[1], [0], [0], [1], [0, 0, 1, 1], [], []>} : vector<8x72xf32>, vector<72x128xf32>, vector<8x128xf32> -> vector<8x128xf32>
    %c0_3 = arith.constant 0 : index
    %c0_4 = arith.constant 0 : index
    %3 = vector.load %arg5[%c0_3, %c0_4] : memref<8x4xf32, #tpu.memory_space<vmem>>, vector<8x4xf32>
    %c0_5 = arith.constant 0 : index
    %c0_6 = arith.constant 0 : index
    %4 = vector.load %arg4[%c0_5, %c0_6] : memref<4x128xf32, #tpu.memory_space<vmem>>, vector<4x128xf32>
    %cst_7 = arith.constant dense<0.000000e+00> : vector<8x128xf32>
    %5 = tpu.matmul %3, %4, %cst_7 {dimension_numbers = #tpu.dot_dimension_numbers<[1], [0], [0], [1], [0, 0, 1, 1], [], []>} : vector<8x4xf32>, vector<4x128xf32>, vector<8x128xf32> -> vector<8x128xf32>
    %c0_8 = arith.constant 0 : index
    %c0_9 = arith.constant 0 : index
    %6 = vector.load %arg6[%c0_8, %c0_9] : memref<8x1xf32, #tpu.memory_space<vmem>>, vector<8x1xf32>
    %7 = vector.broadcast %6 : vector<8x1xf32> to vector<8x128xf32>
    %8 = arith.addf %5, %7 : vector<8x128xf32>
    %c0_10 = arith.constant 0 : index
    %c0_11 = arith.constant 0 : index
    %9 = vector.load %arg2[%c0_10, %c0_11] : memref<8x1xf32, #tpu.memory_space<vmem>>, vector<8x1xf32>
    %c0_12 = arith.constant 0 : index
    %c0_13 = arith.constant 0 : index
    %10 = vector.load %arg3[%c0_12, %c0_13] : memref<8x1xf32, #tpu.memory_space<vmem>>, vector<8x1xf32>
    %cst_14 = arith.constant dense<0.000000e+00> : vector<8xf32>
    %11 = vector.multi_reduction <add>, %2, %cst_14 [1] : vector<8x128xf32> to vector<8xf32>
    %12 = vector.shape_cast %11 : vector<8xf32> to vector<8x1xf32>
    %cst_15 = arith.constant 1.280000e+02 : f32
    %13 = vector.broadcast %cst_15 : f32 to vector<8x1xf32>
    %14 = arith.divf %12, %13 : vector<8x1xf32>
    %15 = vector.broadcast %14 : vector<8x1xf32> to vector<8x128xf32>
    %16 = arith.subf %2, %15 : vector<8x128xf32>
    %17 = arith.mulf %16, %16 : vector<8x128xf32>
    %cst_16 = arith.constant dense<0.000000e+00> : vector<8xf32>
    %18 = vector.multi_reduction <add>, %17, %cst_16 [1] : vector<8x128xf32> to vector<8xf32>
    %19 = vector.shape_cast %18 : vector<8xf32> to vector<8x1xf32>
    %cst_17 = arith.constant 1.280000e+02 : f32
    %20 = vector.broadcast %cst_17 : f32 to vector<8x1xf32>
    %21 = arith.divf %19, %20 : vector<8x1xf32>
    %22 = vector.broadcast %14 : vector<8x1xf32> to vector<8x128xf32>
    %23 = arith.subf %2, %22 : vector<8x128xf32>
    %cst_18 = arith.constant 9.99999974E-6 : f32
    %24 = vector.broadcast %cst_18 : f32 to vector<8x1xf32>
    %25 = arith.addf %21, %24 : vector<8x1xf32>
    %26 = math.rsqrt %25 : vector<8x1xf32>
    %27 = vector.broadcast %26 : vector<8x1xf32> to vector<8x128xf32>
    %28 = arith.mulf %23, %27 : vector<8x128xf32>
    %29 = vector.broadcast %9 : vector<8x1xf32> to vector<8x128xf32>
    %30 = arith.mulf %28, %29 : vector<8x128xf32>
    %31 = vector.broadcast %10 : vector<8x1xf32> to vector<8x128xf32>
    %32 = arith.addf %30, %31 : vector<8x128xf32>
    %33 = arith.addf %32, %8 : vector<8x128xf32>
    %cst_19 = arith.constant 0.000000e+00 : f32
    %34 = vector.broadcast %cst_19 : f32 to vector<8x128xf32>
    %35 = arith.maximumf %33, %34 : vector<8x128xf32>
    %c0_20 = arith.constant 0 : index
    %c0_21 = arith.constant 0 : index
    %36 = vector.load %arg7[%c0_20, %c0_21] : memref<8x128xf32, #tpu.memory_space<vmem>>, vector<8x128xf32>
    tpu.vector_store %arg7[%c0_20, %c0_21], %35 {strides = array<i32>} : memref<8x128xf32, #tpu.memory_space<vmem>>, vector<8x128xf32>,
    return
  }
}

</mosaic_0001>

<bundles_post_ra>
// kernel: resnet18_module.4
= control target key start
LH: loop header
LB: loop body
LE: loop exit
PB: predicated region body
PF: predicated region fallthrough
CT: control target
= control target key end

     0   :  { %v168_v0 = vmov 0.0|0.0   ;;  %vm169_vm0 = vmmov 0   ;;  %v170_v4 = vmov 0.0   ;;  %vm27_vm1 = vcmask 1043456   ;;  %s224_s0 = inlined_call_operand.vmem [shape: f32[36,128], index: 0, kind: input, shape index: {}]   ;;  %s225_s1 = inlined_call_operand.vmem [shape: f32[8,36], index: 1, kind: input, shape index: {}]   ;;  %s226_s2 = inlined_call_operand.vmem [shape: f32[8,1], index: 2, kind: input, shape index: {}]   ;;  %s227_s3 = inlined_call_operand.vmem [shape: f32[8,1], index: 3, kind: input, shape index: {}]   ;;  %s228_s4 = inlined_call_operand.vmem [shape: f32[8,128], index: 4, kind: output, shape index: {}]  }
   0x1   :  { %154 = vmatprep.subr.bf16.mxu0 %v168_v0  ;;  %v18_v1 = vld [vmem:[%s224_s0] sm:$0xff]  ;;  %v19_v2 = vld [vmem:[%s224_s0 + $0x8] sm:$0xff]  ;;  %v20_v3 = vld [vmem:[%s224_s0 + $0x10] sm:$0xff]  ;;  %151 = vmatprep.mubr.msk.f32.mxu0 %vm169_vm0, %v170_v4  ;;  %vm23_vm2 = vcmask 293888   ;;  %v171_v12 = vmov 0  }
   0x2   :  { %v155_v5 = vpack.c.bf16 %v19_v2, %v18_v1  ;;  %v21_v6 = vld [vmem:[%s224_s0 + $0x18] sm:$0xff]  ;;  %v22_v8 = vld [vmem:[%s224_s0 + $0x20] sm:$0xf]  ;;  %164 = vset.pattern.permute.xlu1 %v171_v12  ;;  %165 = vset.pattern.permute.xlu0 %v171_v12 }
   0x3   :  { %v158_v7 = vpack.c.bf16 %v21_v6, %v20_v3  ;;  %v17_v9 = vld [vmem:[%s225_s1] sm:$0xff] }
   0x4   :  { %156 = vmatpush3.bf16.msra.mxu0 %v155_v5  ;;  %v101_v13 = vld [vmem:[%s226_s2] sm:$0xff] }
   0x5   :  { %157 = vmatprep.subr.bf16.mxu0 %v168_v0  ;;  %117 = vperm.xlu1 %164, %v101_v13   ;;  %v102_v14 = vld [vmem:[%s227_s3] sm:$0xff] }
   0x8   :  { %159 = vmatpush3.bf16.msra.mxu0 %v158_v7 }
   0x9   :  { %149 = vmatprep.subr.mxu0 %v170_v4  ;;  %123 = vperm.xlu1 %164, %v102_v14  }
   0xc   :  { %150 = vmatpush3.msk.msra.mxu0 %vm27_vm1, %v22_v8 }
   0xd   :  { %152 = vmatmul.mubr.msk.f32.vlgmr.msra.gmra.mrb[0].mxu0 %vm23_vm2, %v17_v9 }
  0x84   :  { %v118_v22 = vpop.permute.xlu1 %117 }
  0x88   :  { %v124_v26 = vpop.permute.xlu1 %123 }
  0xe0   :  { %v97_v10 = vpop.f32.mrb[0].mxu0 }
  0xe1   :  { %103 = vadd.xlane.f32.xlu0 %v97_v10  ;;  %v153_v11 = vpop.f32.mrb[1].mxu0 }
 0x16e   :  { %v104_v15 = vpop.xlane.xlu0 %103 }
 0x16f   :  { %v106_v16 = vmul.f32 0.0078125, %v104_v15 }
 0x171   :  { %v107_v17 = vsub.f32 %v97_v10, %v106_v16 }
 0x173   :  { %v108_v18 = vmul.f32 %v107_v17, %v107_v17 }
 0x175   :  { %109 = vadd.xlane.f32.xlu0 %v108_v18 }
 0x202   :  { %v110_v19 = vpop.xlane.xlu0 %109 }
 0x203   :  { %v111_v20 = vmul.f32 0.0078125, %v110_v19 }
 0x205   :  { %v112_v21 = vadd.f32 1e-05, %v111_v20 }
 0x207   :  { %166 = vrsqrt.f32 %v112_v21 }
 0x211   :  { %v167_v23 = vpop.eup %166 }
 0x212   :  { %v114_v24 = vmul.f32 %v167_v23, %v107_v17 }
 0x214   :  { %v120_v25 = vmul.f32 %v118_v22, %v114_v24 }
 0x216   :  { %v126_v27 = vadd.f32 %v124_v26, %v120_v25 }
 0x218   :  { %v127_v28 = vmax.f32 %v126_v27, 0.0 }
 0x21a   :  { %128 = vst [vmem:[%s228_s4] sm:$0xff] %v127_v28 }

// kernel: resnet18_module.7
= control target key start
LH: loop header
LB: loop body
LE: loop exit
PB: predicated region body
PF: predicated region fallthrough
CT: control target
= control target key end

     0   :  { %v190_v0 = vmov 0.0|0.0   ;;  %vm191_vm0 = vmmov 0   ;;  %v192_v4 = vmov 0.0   ;;  %vm30_vm1 = vcmask 588800   ;;  %s266_s0 = inlined_call_operand.vmem [shape: f32[72,128], index: 0, kind: input, shape index: {}]   ;;  %s267_s1 = inlined_call_operand.vmem [shape: f32[8,72], index: 1, kind: input, shape index: {}]   ;;  %s268_s2 = inlined_call_operand.vmem [shape: f32[8,1], index: 2, kind: input, shape index: {}]   ;;  %s269_s3 = inlined_call_operand.vmem [shape: f32[8,1], index: 3, kind: input, shape index: {}]   ;;  %s270_s4 = inlined_call_operand.vmem [shape: f32[8,128], index: 4, kind: input, shape index: {}]   ;;  %s271_s5 = inlined_call_operand.vmem [shape: f32[8,128], index: 5, kind: output, shape index: {}]  }
   0x1   :  { %170 = vmatprep.subr.bf16.mxu0 %v190_v0  ;;  %v21_v1 = vld [vmem:[%s266_s0] sm:$0xff]  ;;  %v22_v2 = vld [vmem:[%s266_s0 + $0x8] sm:$0xff]  ;;  %v23_v3 = vld [vmem:[%s266_s0 + $0x10] sm:$0xff]  ;;  %167 = vmatprep.mubr.msk.f32.mxu0 %vm191_vm0, %v192_v4  ;;  %v193_v18 = vmov 0  }
   0x2   :  { %v171_v5 = vpack.c.bf16 %v22_v2, %v21_v1  ;;  %v24_v6 = vld [vmem:[%s266_s0 + $0x18] sm:$0xff]  ;;  %v25_v8 = vld [vmem:[%s266_s0 + $0x20] sm:$0xff]  ;;  %v26_v9 = vld [vmem:[%s266_s0 + $0x28] sm:$0xff]  ;;  %186 = vset.pattern.permute.xlu1 %v193_v18  ;;  %187 = vset.pattern.permute.xlu0 %v193_v18 }
   0x3   :  { %v174_v7 = vpack.c.bf16 %v24_v6, %v23_v3  ;;  %v177_v10 = vpack.c.bf16 %v26_v9, %v25_v8  ;;  %v27_v11 = vld [vmem:[%s266_s0 + $0x30] sm:$0xff]  ;;  %v28_v12 = vld [vmem:[%s266_s0 + $0x38] sm:$0xff]  ;;  %v29_v14 = vld [vmem:[%s266_s0 + $0x40] sm:$0xff] }
   0x4   :  { %172 = vmatpush3.bf16.msra.mxu0 %v171_v5  ;;  %v180_v13 = vpack.c.bf16 %v28_v12, %v27_v11  ;;  %v20_v15 = vld [vmem:[%s267_s1] sm:$0xff] }
   0x5   :  { %173 = vmatprep.subr.bf16.mxu0 %v190_v0  ;;  %v104_v19 = vld [vmem:[%s268_s2] sm:$0xff] }
   0x6   :  { %120 = vperm.xlu1 %186, %v104_v19   ;;  %v105_v20 = vld [vmem:[%s269_s3] sm:$0xff] }
   0x7   :  { %v130_v32 = vld [vmem:[%s270_s4] sm:$0xff] }
   0x8   :  { %175 = vmatpush3.bf16.msra.mxu0 %v174_v7 }
   0x9   :  { %176 = vmatprep.subr.bf16.mxu0 %v190_v0 }
   0xa   :  { %126 = vperm.xlu1 %186, %v105_v20  }
   0xc   :  { %178 = vmatpush3.bf16.msra.mxu0 %v177_v10 }
   0xd   :  { %179 = vmatprep.subr.bf16.mxu0 %v190_v0 }
  0x10   :  { %181 = vmatpush3.bf16.msra.mxu0 %v180_v13 }
  0x11   :  { %165 = vmatprep.subr.mxu0 %v192_v4 }
  0x14   :  { %166 = vmatpush3.msra.mxu0 %v29_v14 }
  0x15   :  { %168 = vmatmul.mubr.msk.f32.vlgmr.msra.gmra.mrb[0].mxu0 %vm30_vm1, %v20_v15 }
  0x85   :  { %v121_v28 = vpop.permute.xlu1 %120 }
  0x89   :  { %v127_v33 = vpop.permute.xlu1 %126 }
  0xe8   :  { %v100_v16 = vpop.f32.mrb[0].mxu0 }
  0xe9   :  { %106 = vadd.xlane.f32.xlu0 %v100_v16  ;;  %v169_v17 = vpop.f32.mrb[1].mxu0 }
 0x176   :  { %v107_v21 = vpop.xlane.xlu0 %106 }
 0x177   :  { %v109_v22 = vmul.f32 0.0078125, %v107_v21 }
 0x179   :  { %v110_v23 = vsub.f32 %v100_v16, %v109_v22 }
 0x17b   :  { %v111_v24 = vmul.f32 %v110_v23, %v110_v23 }
 0x17d   :  { %112 = vadd.xlane.f32.xlu0 %v111_v24 }
 0x20a   :  { %v113_v25 = vpop.xlane.xlu0 %112 }
 0x20b   :  { %v114_v26 = vmul.f32 0.0078125, %v113_v25 }
 0x20d   :  { %v115_v27 = vadd.f32 1e-05, %v114_v26 }
 0x20f   :  { %188 = vrsqrt.f32 %v115_v27 }
 0x219   :  { %v189_v29 = vpop.eup %188 }
 0x21a   :  { %v117_v30 = vmul.f32 %v189_v29, %v110_v23 }
 0x21c   :  { %v123_v31 = vmul.f32 %v121_v28, %v117_v30 }
 0x21e   :  { %v129_v34 = vadd.f32 %v127_v33, %v123_v31 }
 0x220   :  { %v131_v35 = vadd.f32 %v130_v32, %v129_v34 }
 0x222   :  { %v132_v36 = vmax.f32 %v131_v35, 0.0 }
 0x224   :  { %133 = vst [vmem:[%s271_s5] sm:$0xff] %v132_v36 }

// kernel: resnet18_module.6
= control target key start
LH: loop header
LB: loop body
LE: loop exit
PB: predicated region body
PF: predicated region fallthrough
CT: control target
= control target key end

     0   :  { %v185_v0 = vmov 0.0|0.0   ;;  %vm186_vm0 = vmmov 0   ;;  %v187_v4 = vmov 0.0   ;;  %vm27_vm1 = vcmask 588800   ;;  %s253_s0 = inlined_call_operand.vmem [shape: f32[72,128], index: 0, kind: input, shape index: {}]   ;;  %s254_s1 = inlined_call_operand.vmem [shape: f32[8,72], index: 1, kind: input, shape index: {}]   ;;  %s255_s2 = inlined_call_operand.vmem [shape: f32[8,1], index: 2, kind: input, shape index: {}]   ;;  %s256_s3 = inlined_call_operand.vmem [shape: f32[8,1], index: 3, kind: input, shape index: {}]   ;;  %s257_s4 = inlined_call_operand.vmem [shape: f32[8,128], index: 4, kind: output, shape index: {}]  }
   0x1   :  { %165 = vmatprep.subr.bf16.mxu0 %v185_v0  ;;  %v18_v1 = vld [vmem:[%s253_s0] sm:$0xff]  ;;  %v19_v2 = vld [vmem:[%s253_s0 + $0x8] sm:$0xff]  ;;  %v20_v3 = vld [vmem:[%s253_s0 + $0x10] sm:$0xff]  ;;  %162 = vmatprep.mubr.msk.f32.mxu0 %vm186_vm0, %v187_v4  ;;  %v188_v18 = vmov 0  }
   0x2   :  { %v166_v5 = vpack.c.bf16 %v19_v2, %v18_v1  ;;  %v21_v6 = vld [vmem:[%s253_s0 + $0x18] sm:$0xff]  ;;  %v22_v8 = vld [vmem:[%s253_s0 + $0x20] sm:$0xff]  ;;  %v23_v9 = vld [vmem:[%s253_s0 + $0x28] sm:$0xff]  ;;  %181 = vset.pattern.permute.xlu1 %v188_v18  ;;  %182 = vset.pattern.permute.xlu0 %v188_v18 }
   0x3   :  { %v169_v7 = vpack.c.bf16 %v21_v6, %v20_v3  ;;  %v172_v10 = vpack.c.bf16 %v23_v9, %v22_v8  ;;  %v24_v11 = vld [vmem:[%s253_s0 + $0x30] sm:$0xff]  ;;  %v25_v12 = vld [vmem:[%s253_s0 + $0x38] sm:$0xff]  ;;  %v26_v14 = vld [vmem:[%s253_s0 + $0x40] sm:$0xff] }
   0x4   :  { %167 = vmatpush3.bf16.msra.mxu0 %v166_v5  ;;  %v175_v13 = vpack.c.bf16 %v25_v12, %v24_v11  ;;  %v17_v15 = vld [vmem:[%s254_s1] sm:$0xff] }
   0x5   :  { %168 = vmatprep.subr.bf16.mxu0 %v185_v0  ;;  %v101_v19 = vld [vmem:[%s255_s2] sm:$0xff] }
   0x6   :  { %117 = vperm.xlu1 %181, %v101_v19   ;;  %v102_v20 = vld [vmem:[%s256_s3] sm:$0xff] }
   0x8   :  { %170 = vmatpush3.bf16.msra.mxu0 %v169_v7 }
   0x9   :  { %171 = vmatprep.subr.bf16.mxu0 %v185_v0 }
   0xa   :  { %123 = vperm.xlu1 %181, %v102_v20  }
   0xc   :  { %173 = vmatpush3.bf16.msra.mxu0 %v172_v10 }
   0xd   :  { %174 = vmatprep.subr.bf16.mxu0 %v185_v0 }
  0x10   :  { %176 = vmatpush3.bf16.msra.mxu0 %v175_v13 }
  0x11   :  { %160 = vmatprep.subr.mxu0 %v187_v4 }
  0x14   :  { %161 = vmatpush3.msra.mxu0 %v26_v14 }
  0x15   :  { %163 = vmatmul.mubr.msk.f32.vlgmr.msra.gmra.mrb[0].mxu0 %vm27_vm1, %v17_v15 }
  0x85   :  { %v118_v28 = vpop.permute.xlu1 %117 }
  0x89   :  { %v124_v32 = vpop.permute.xlu1 %123 }
  0xe8   :  { %v97_v16 = vpop.f32.mrb[0].mxu0 }
  0xe9   :  { %103 = vadd.xlane.f32.xlu0 %v97_v16  ;;  %v164_v17 = vpop.f32.mrb[1].mxu0 }
 0x176   :  { %v104_v21 = vpop.xlane.xlu0 %103 }
 0x177   :  { %v106_v22 = vmul.f32 0.0078125, %v104_v21 }
 0x179   :  { %v107_v23 = vsub.f32 %v97_v16, %v106_v22 }
 0x17b   :  { %v108_v24 = vmul.f32 %v107_v23, %v107_v23 }
 0x17d   :  { %109 = vadd.xlane.f32.xlu0 %v108_v24 }
 0x20a   :  { %v110_v25 = vpop.xlane.xlu0 %109 }
 0x20b   :  { %v111_v26 = vmul.f32 0.0078125, %v110_v25 }
 0x20d   :  { %v112_v27 = vadd.f32 1e-05, %v111_v26 }
 0x20f   :  { %183 = vrsqrt.f32 %v112_v27 }
 0x219   :  { %v184_v29 = vpop.eup %183 }
 0x21a   :  { %v114_v30 = vmul.f32 %v184_v29, %v107_v23 }
 0x21c   :  { %v120_v31 = vmul.f32 %v118_v28, %v114_v30 }
 0x21e   :  { %v126_v33 = vadd.f32 %v124_v32, %v120_v31 }
 0x220   :  { %v127_v34 = vmax.f32 %v126_v33, 0.0 }
 0x222   :  { %128 = vst [vmem:[%s257_s4] sm:$0xff] %v127_v34 }

// kernel: resnet18_module.5
= control target key start
LH: loop header
LB: loop body
LE: loop exit
PB: predicated region body
PF: predicated region fallthrough
CT: control target
= control target key end

     0   :  { %v290_v0 = vmov 0.0|0.0   ;;  %vm291_vm0 = vmmov 0   ;;  %v292_v4 = vmov 0.0   ;;  %vm36_vm1 = vcmask 588800   ;;  %s382_s0 = inlined_call_operand.vmem [shape: f32[72,128], index: 0, kind: input, shape index: {}]   ;;  %s383_s1 = inlined_call_operand.vmem [shape: f32[8,72], index: 1, kind: input, shape index: {}]   ;;  %s384_s4 = inlined_call_operand.vmem [shape: f32[4,128], index: 4, kind: input, shape index: {}]   ;;  %s385_s5 = inlined_call_operand.vmem [shape: f32[8,4], index: 5, kind: input, shape index: {}]   ;;  %s386_s2 = inlined_call_operand.vmem [shape: f32[8,1], index: 2, kind: input, shape index: {}]   ;;  %s387_s6 = inlined_call_operand.vmem [shape: f32[8,1], index: 6, kind: input, shape index: {}]   ;;  %s388_s3 = inlined_call_operand.vmem [shape: f32[8,1], index: 3, kind: input, shape index: {}]   ;;  %s389_s7 = inlined_call_operand.vmem [shape: f32[8,128], index: 7, kind: output, shape index: {}]  }
   0x1   :  { %270 = vmatprep.subr.bf16.mxu0 %v290_v0  ;;  %v27_v1 = vld [vmem:[%s382_s0] sm:$0xff]  ;;  %v28_v2 = vld [vmem:[%s382_s0 + $0x8] sm:$0xff]  ;;  %v29_v3 = vld [vmem:[%s382_s0 + $0x10] sm:$0xff]  ;;  %262 = vmatprep.mubr.msk.f32.mxu0 %vm291_vm0, %v292_v4  ;;  %vm122_vm2 = vcmask 1043456   ;;  %vm118_vm3 = vcmask 31744   ;;  %v293_v20 = vmov 0  }
   0x2   :  { %v271_v5 = vpack.c.bf16 %v28_v2, %v27_v1  ;;  %v30_v6 = vld [vmem:[%s382_s0 + $0x18] sm:$0xff]  ;;  %265 = vmatprep.subr.mxu1 %v292_v4  ;;  %267 = vmatprep.mubr.msk.f32.mxu1 %vm291_vm0, %v292_v4  ;;  %v31_v8 = vld [vmem:[%s382_s0 + $0x20] sm:$0xff]  ;;  %v32_v9 = vld [vmem:[%s382_s0 + $0x28] sm:$0xff] }
   0x3   :  { %v274_v7 = vpack.c.bf16 %v30_v6, %v29_v3  ;;  %v277_v10 = vpack.c.bf16 %v32_v9, %v31_v8  ;;  %v33_v11 = vld [vmem:[%s382_s0 + $0x30] sm:$0xff]  ;;  %v34_v12 = vld [vmem:[%s382_s0 + $0x38] sm:$0xff]  ;;  %v35_v14 = vld [vmem:[%s382_s0 + $0x40] sm:$0xff]  ;;  %286 = vset.pattern.permute.xlu1 %v293_v20  ;;  %287 = vset.pattern.permute.xlu0 %v293_v20 }
   0x4   :  { %272 = vmatpush3.bf16.msra.mxu0 %v271_v5  ;;  %v280_v13 = vpack.c.bf16 %v34_v12, %v33_v11  ;;  %v26_v15 = vld [vmem:[%s383_s1] sm:$0xff] }
   0x5   :  { %273 = vmatprep.subr.bf16.mxu0 %v290_v0  ;;  %v111_v16 = vld [vmem:[%s384_s4] sm:$0xf] }
   0x6   :  { %v110_v17 = vld [vmem:[%s385_s5] sm:$0xff]  ;;  %266 = vmatpush3.msk.msra.mxu1 %vm122_vm2, %v111_v16 }
   0x7   :  { %268 = vmatmul.mubr.msk.f32.vlgmr.msra.gmra.mrb[0].mxu1 %vm118_vm3, %v110_v17  ;;  %v196_v21 = vld [vmem:[%s386_s2] sm:$0xff] }
   0x8   :  { %275 = vmatpush3.bf16.msra.mxu0 %v274_v7  ;;  %212 = vperm.xlu1 %286, %v196_v21   ;;  %v112_v22 = vld [vmem:[%s387_s6] sm:$0xff] }
   0x9   :  { %276 = vmatprep.subr.bf16.mxu0 %v290_v0  ;;  %v197_v27 = vld [vmem:[%s388_s3] sm:$0xff] }
   0xc   :  { %278 = vmatpush3.bf16.msra.mxu0 %v277_v10  ;;  %115 = vperm.xlu1 %286, %v112_v22  }
   0xd   :  { %279 = vmatprep.subr.bf16.mxu0 %v290_v0 }
  0x10   :  { %281 = vmatpush3.bf16.msra.mxu0 %v280_v13 }
  0x11   :  { %260 = vmatprep.subr.mxu0 %v292_v4 }
  0x14   :  { %261 = vmatpush3.msra.mxu0 %v35_v14 }
  0x15   :  { %263 = vmatmul.mubr.msk.f32.vlgmr.msra.gmra.mrb[0].mxu0 %vm36_vm1, %v26_v15 }
  0x87   :  { %v213_v33 = vpop.permute.xlu1 %212 }
  0x8b   :  { %v116_v36 = vpop.permute.xlu1 %115 }
  0xda   :  { %v192_v28 = vpop.f32.mrb[0].mxu1 }
  0xdb   :  { %v269_v29 = vpop.f32.mrb[1].mxu1  ;;  %v193_v39 = vadd.f32 %v192_v28, %v116_v36 }
  0xe8   :  { %v106_v18 = vpop.f32.mrb[0].mxu0 }
  0xe9   :  { %198 = vadd.xlane.f32.xlu0 %v106_v18  ;;  %v264_v19 = vpop.f32.mrb[1].mxu0 }
 0x176   :  { %v199_v23 = vpop.xlane.xlu0 %198 }
 0x177   :  { %v201_v24 = vmul.f32 0.0078125, %v199_v23 }
 0x179   :  { %v202_v25 = vsub.f32 %v106_v18, %v201_v24 }
 0x17b   :  { %v203_v26 = vmul.f32 %v202_v25, %v202_v25 }
 0x17d   :  { %204 = vadd.xlane.f32.xlu0 %v203_v26 }
 0x193   :  { %218 = vperm.xlu0 %287, %v197_v27  }
 0x20a   :  { %v205_v30 = vpop.xlane.xlu0 %204 }
 0x20b   :  { %v206_v31 = vmul.f32 0.0078125, %v205_v30 }
 0x20d   :  { %v207_v32 = vadd.f32 1e-05, %v206_v31 }
 0x20f   :  { %288 = vrsqrt.f32 %v207_v32 }
 0x212   :  { %v219_v37 = vpop.permute.xlu0 %218 }
 0x219   :  { %v289_v34 = vpop.eup %288 }
 0x21a   :  { %v209_v35 = vmul.f32 %v289_v34, %v202_v25 }
 0x21c   :  { %v215_v38 = vmul.f32 %v213_v33, %v209_v35 }
 0x21e   :  { %v221_v40 = vadd.f32 %v219_v37, %v215_v38 }
 0x220   :  { %v222_v41 = vadd.f32 %v221_v40, %v193_v39 }
 0x222   :  { %v223_v42 = vmax.f32 %v222_v41, 0.0 }
 0x224   :  { %224 = vst [vmem:[%s389_s7] sm:$0xff] %v223_v42 }

</bundles_post_ra>
